<compile_context>
chip_gen: v6e
topology: v6e:2x2x1
jax: 0.10.0
libtpu: 0.0.40
codegen_flags: <defaults>
</compile_context>

<pallas_src>
import jax
import jax.numpy as jnp
from jax.experimental import pallas as pl
from jax.experimental.pallas import tpu as pltpu

_LOG2E = 1.4426950408889634


def _dst_activation_kernel(x_ref, ngl_ref, alpha_ref, o_ref):
    # x_ref:     (TB, P) input tile (tail block may contain masked garbage rows)
    # ngl_ref:   (1,  P) = -(eta_w ** 2) * log2(e)   (f32, resident)
    # alpha_ref: (1,  P) = sigmoid(xi_w)             (f32, resident)
    x = x_ref[...].astype(jnp.float32)
    si = jnp.exp2(ngl_ref[...] * x) * alpha_ref[...]          # (TB, P) f32
    max_val = jnp.max(si, axis=-1, keepdims=True)             # (TB, 1)
    # Exact reciprocal: approx=True (~2e-4 rel err) would break 1e-5 tolerance.
    inv = pl.reciprocal(max_val + 0.0001, approx=False)
    o_ref[...] = (si * inv).astype(o_ref.dtype)


def _num_tensorcores():
    """Best-effort TensorCores-per-chip detection (v7x has 2). Fallback: 1."""
    try:
        info = pltpu.get_tpu_info()
        for attr in ("num_cores", "core_count", "num_tensorcores",
                     "tensorcores_per_chip"):
            v = getattr(info, attr, None)
            if isinstance(v, int) and v > 0:
                return v
    except Exception:
        pass
    try:
        v = getattr(jax.devices()[0], "num_cores", None)
        if isinstance(v, int) and v > 0:
            return v
    except Exception:
        pass
    return 1


def distance_activation(inputs, eta_w, xi_w, *, batch_tile=None,
                        target_tile_bytes=2 << 20, num_cores=None):
    """inputs: (B, P); eta_w, xi_w: (1, P) module parameters."""
    B, P = inputs.shape
    dtype = inputs.dtype
    itemsize = jnp.dtype(dtype).itemsize

    # --- parameters -> hoisted constants (tiny one-off XLA ops) ---------------
    neg_gamma_log2e = (-(jnp.square(eta_w)) * _LOG2E).astype(jnp.float32)  # (1,P)
    alpha = (1.0 / (jnp.exp(-xi_w) + 1.0)).astype(jnp.float32)             # (1,P)

    # --- batch tile sizing (multiple of 8 rows; last dim stays full P) --------
    if num_cores is None:
        num_cores = _num_tensorcores()
    if batch_tile is None:
        rows = max(8, (target_tile_bytes // max(P * itemsize, 1)) // 8 * 8)
        batch_tile = min(rows, ((B + 7) // 8) * 8)
        # Multi-TC chips (v7x): aim for >= 2 grid steps per core so per-core
        # input/output DMA stays double-buffered.  Never split on 1-TC chips.
        if num_cores > 1 and B >= 8 * 2 * num_cores:
            min_steps = 2 * num_cores
            while pl.cdiv(B, batch_tile) < min_steps and batch_tile > 8:
                batch_tile = max(8, ((batch_tile // 2) + 7) // 8 * 8)
    else:
        batch_tile = max(8, (batch_tile // 8) * 8)

    n_tiles = pl.cdiv(B, batch_tile)

    # --- VMEM budget: double-buffered in + out tiles dominate -----------------
    tile_bytes = batch_tile * P * itemsize
    vmem_needed = 4 * tile_bytes + 4 * P * 4 + (1 << 20)
    vmem_limit = int(min(32 << 20, max(16 << 20, vmem_needed)))
    # TODO(synk): for extremely large P (where 4 x 8 rows x P x 4B exceeds the
    # VMEM cap) add a P-tiling grid axis with a running row-max + rescale.

    cost = pl.CostEstimate(
        flops=4 * B * P,
        transcendentals=B * P,
        bytes_accessed=2 * B * P * itemsize,
    )

    out = pl.pallas_call(
        _dst_activation_kernel,
        out_shape=jax.ShapeDtypeStruct((B, P), dtype),
        grid_spec=pltpu.PrefetchScalarGridSpec(
            num_scalar_prefetch=0,
            grid=(n_tiles,),
            in_specs=[
                pl.BlockSpec((batch_tile, P), lambda i: (i, 0)),  # input tile
                pl.BlockSpec((1, P), lambda i: (0, 0)),           # -gamma*log2e
                pl.BlockSpec((1, P), lambda i: (0, 0)),           # alpha
            ],
            out_specs=pl.BlockSpec((batch_tile, P), lambda i: (i, 0)),
        ),
        compiler_params=pltpu.CompilerParams(
            dimension_semantics=("parallel",),
            vmem_limit_bytes=vmem_limit,
        ),
        cost_estimate=cost,
    )(inputs, neg_gamma_log2e, alpha)

    return out


def distance_activation_ref(inputs, eta_w, xi_w):
    """Pure-JAX reference mirroring the PyTorch forward."""
    gamma = jnp.square(eta_w)
    alpha = 1.0 / (jnp.exp(-xi_w) + 1.0)
    si = jnp.exp(-(gamma * inputs)) * alpha
    max_val = jnp.max(si, axis=-1, keepdims=True)
    return si / (max_val + 0.0001)


if __name__ == "__main__":
    key = jax.random.PRNGKey(0)
    k1, k2, k3, k4, k5 = jax.random.split(key, 5)

    # Case 1: module defaults (constant-init weights), small shapes.
    n_prototypes = 32
    init_alpha = 0.0
    init_gamma = 0.1
    batch = 16
    x = jax.random.uniform(k1, (batch, n_prototypes), dtype=jnp.float32) * 4.0
    eta_w = jnp.full((1, n_prototypes), init_gamma, dtype=jnp.float32)
    xi_w = jnp.full((1, n_prototypes), init_alpha, dtype=jnp.float32)

    out = jax.block_until_ready(distance_activation(x, eta_w, xi_w))
    ref = distance_activation_ref(x, eta_w, xi_w)
    assert out.shape == (batch, n_prototypes)
    assert jnp.allclose(out, ref, atol=1e-5, rtol=1e-5), "mismatch (case 1)"

    # Case 2: random weights, batch not divisible by 8 (exercises masked tail).
    batch2 = 23
    x2 = jax.random.uniform(k2, (batch2, n_prototypes), dtype=jnp.float32) * 4.0
    eta_w2 = jax.random.normal(k3, (1, n_prototypes), dtype=jnp.float32) * 0.2
    xi_w2 = jax.random.normal(k4, (1, n_prototypes), dtype=jnp.float32)

    out2 = jax.block_until_ready(distance_activation(x2, eta_w2, xi_w2))
    ref2 = distance_activation_ref(x2, eta_w2, xi_w2)
    assert out2.shape == (batch2, n_prototypes)
    assert jnp.allclose(out2, ref2, atol=1e-5, rtol=1e-5), "mismatch (case 2)"

    # Case 3: multi-step grid with a partial (masked) last block, odd P.
    batch3, P3 = 203, 48
    x3 = jax.random.uniform(k5, (batch3, P3), dtype=jnp.float32) * 4.0
    eta_w3 = jnp.full((1, P3), 0.1, dtype=jnp.float32)
    xi_w3 = jnp.zeros((1, P3), dtype=jnp.float32)

    out3 = jax.block_until_ready(
        distance_activation(x3, eta_w3, xi_w3, batch_tile=64))
    ref3 = distance_activation_ref(x3, eta_w3, xi_w3)
    assert out3.shape == (batch3, P3)
    assert jnp.allclose(out3, ref3, atol=1e-5, rtol=1e-5), "mismatch (case 3)"

    print("KERNEL_OK")
</pallas_src>

<mosaic_0001>
module attributes {stable_mosaic.version = 11 : i64} {
  func.func @_dst_activation_kernel(%arg0: i32, %arg1: memref<16x32xf32, #tpu.memory_space<vmem>>, %arg2: memref<1x32xf32, #tpu.memory_space<vmem>>, %arg3: memref<1x32xf32, #tpu.memory_space<vmem>>, %arg4: memref<16x32xf32, #tpu.memory_space<vmem>>) attributes {dimension_semantics = [#tpu.dimension_semantics<parallel>], iteration_bounds = array<i64: 1>, scalar_prefetch = 0 : i64, scratch_operands = 0 : i64, tpu.core_type = #tpu.core_type<tc>, window_params = [{transform_indices = @transform_0, window_bounds = array<i64: 16, 32>}, {pipeline_mode = #tpu.pipeline_mode<synchronous>, transform_indices = @transform_1, window_bounds = array<i64: 1, 32>}, {pipeline_mode = #tpu.pipeline_mode<synchronous>, transform_indices = @transform_2, window_bounds = array<i64: 1, 32>}, {transform_indices = @transform_3, window_bounds = array<i64: 16, 32>}]} {
    %c0 = arith.constant 0 : index
    %c0_0 = arith.constant 0 : index
    %0 = vector.load %arg1[%c0, %c0_0] : memref<16x32xf32, #tpu.memory_space<vmem>>, vector<16x32xf32>
    %c0_1 = arith.constant 0 : index
    %c0_2 = arith.constant 0 : index
    %1 = vector.load %arg2[%c0_1, %c0_2] : memref<1x32xf32, #tpu.memory_space<vmem>>, vector<1x32xf32>
    %2 = vector.broadcast %1 : vector<1x32xf32> to vector<16x32xf32>
    %3 = arith.mulf %2, %0 : vector<16x32xf32>
    %4 = math.exp2 %3 : vector<16x32xf32>
    %c0_3 = arith.constant 0 : index
    %c0_4 = arith.constant 0 : index
    %5 = vector.load %arg3[%c0_3, %c0_4] : memref<1x32xf32, #tpu.memory_space<vmem>>, vector<1x32xf32>
    %6 = vector.broadcast %5 : vector<1x32xf32> to vector<16x32xf32>
    %7 = arith.mulf %4, %6 : vector<16x32xf32>
    %cst = arith.constant dense<0xFF800000> : vector<16xf32>
    %8 = vector.multi_reduction <maximumf>, %7, %cst [1] : vector<16x32xf32> to vector<16xf32>
    %9 = vector.shape_cast %8 : vector<16xf32> to vector<16x1xf32>
    %cst_5 = arith.constant 9.99999974E-5 : f32
    %10 = vector.broadcast %cst_5 : f32 to vector<16x1xf32>
    %11 = arith.addf %9, %10 : vector<16x1xf32>
    %12 = tpu.reciprocal %11 : vector<16x1xf32> -> vector<16x1xf32>
    %13 = vector.broadcast %12 : vector<16x1xf32> to vector<16x32xf32>
    %14 = arith.mulf %7, %13 : vector<16x32xf32>
    %c0_6 = arith.constant 0 : index
    %c0_7 = arith.constant 0 : index
    %15 = vector.load %arg4[%c0_6, %c0_7] : memref<16x32xf32, #tpu.memory_space<vmem>>, vector<16x32xf32>
    tpu.vector_store %arg4[%c0_6, %c0_7], %14 {strides = array<i32>} : memref<16x32xf32, #tpu.memory_space<vmem>>, vector<16x32xf32>,
    return
  }
  func.func @transform_0(%arg0: i32) -> (i32, i32) {
    %c0_i32 = arith.constant 0 : i32
    %c0_i32_0 = arith.constant 0 : i32
    return %arg0, %c0_i32 : i32, i32
  }
  func.func @transform_1(%arg0: i32) -> (i32, i32) {
    %c0_i32 = arith.constant 0 : i32
    %c0_i32_0 = arith.constant 0 : i32
    %c0_i32_1 = arith.constant 0 : i32
    return %c0_i32, %c0_i32_0 : i32, i32
  }
  func.func @transform_2(%arg0: i32) -> (i32, i32) {
    %c0_i32 = arith.constant 0 : i32
    %c0_i32_0 = arith.constant 0 : i32
    %c0_i32_1 = arith.constant 0 : i32
    return %c0_i32, %c0_i32_0 : i32, i32
  }
  func.func @transform_3(%arg0: i32) -> (i32, i32) {
    %c0_i32 = arith.constant 0 : i32
    %c0_i32_0 = arith.constant 0 : i32
    return %arg0, %c0_i32 : i32, i32
  }
}

</mosaic_0001>

<bundles_post_ra>
// kernel: tpu_custom_call.1
= control target key start
LH: loop header
LB: loop body
LE: loop exit
PB: predicated region body
PF: predicated region fallthrough
CT: control target
= control target key end

     0   :  { %8 = vsyncpa [#allocation3], 0  ;;  %s187_s0 = inlined_call_operand.hbm [shape: f32[16,32], index: 0, kind: input, shape index: {}]   ;;  %s188_s1 = inlined_call_operand.vmem [shape: f32[1,32], index: 1, kind: input, shape index: {}]   ;;  %s189_s2 = inlined_call_operand.vmem [shape: f32[1,32], index: 2, kind: input, shape index: {}]   ;;  %s190_s3 = inlined_call_operand.hbm [shape: f32[16,32], index: 3, kind: output, shape index: {}]  }
   0x1   :  { %9 = vsyncpa [#allocation4], 0  ;;  %s141_s12 = smov [#allocation2]  }
   0x2   :  { %s15_s13 = sshll.u32 %s141_s12, 4  ;;  %s16_s13 = int_to_ptr.vmem [resolvable:$true] %s15_s13 }
   0x3   :  { %s105_s14 = scalar_lea.vmem %s16_s13, 256  ;;  %p110_p1 = scmp.lt.s32.totalorder %s16_s13, %s16_s13 }
   0x4   :  { %p106_p0 = scmp.ne.s32.totalorder %s16_s13, %s105_s14  ;;  %p111_p2 = scmp.lt.s32.totalorder %s105_s14, %s105_s14 }
   0x6   :  { %p112_p3 = por %p111_p2, %p110_p1 }
   0x8   :  { %p113_p4 = pnand %p112_p3, %p106_p0 }
   0xa   :  { %116 = shalt.err (!%p113_p4)
}
   0xb   :  { %s142_s15 = smov 128   ;;  %s143_s16 = smov 8  }
   0xc   :  { %21 = dma.hbm_to_vmem [thread:$0]  %s187_s0, 256, %s16_s13, [#allocation3], %s142_s15, %s142_s15, %s143_s16  }
   0xd   :  { %137 = dma.done.wait [#allocation3], 256  }
   0xe   :  { %138 = vsyncadd [#allocation3], 4294967040  ;;  %v29_v0 = vld [vmem:[#allocation2] sm:$0xff]  ;;  %v30_v3 = vld [vmem:[#allocation2 + $0x8] sm:$0xff]  ;;  %vm51_vm0 = vcmask 261120   ;;  %s144_s0 = smov [#allocation5]  }
   0xf   :  { %v83_v1 = vld [vmem:[%s188_s1] ss:$0 sm:$0xff]  ;;  %s71_s1 = sshll.u32 %s144_s0, 4  ;;  %s72_s1 = int_to_ptr.vmem [resolvable:$true] %s71_s1 }
  0x10   :  { %v38_v2 = vmul.f32 %v83_v1, %v29_v0  ;;  %v39_v4 = vmul.f32 %v83_v1, %v30_v3  ;;  %v84_v5 = vld [vmem:[%s189_s2] ss:$0 sm:$0xff]  ;;  %s117_s2 = scalar_lea.vmem %s72_s1, 256  ;;  %p122_p6 = scmp.lt.s32.totalorder %s72_s1, %s72_s1 }
  0x11   :  { %p118_p5 = scmp.ne.s32.totalorder %s72_s1, %s117_s2  ;;  %p123_p7 = scmp.lt.s32.totalorder %s117_s2, %s117_s2 }
  0x12   :  { %89 = vpow2.f32 %v38_v2 }
  0x13   :  { %91 = vpow2.f32 %v39_v4  ;;  %p124_p8 = por %p123_p7, %p122_p6 }
  0x15   :  { %p125_p9 = pnand %p124_p8, %p118_p5 }
  0x1f   :  { %v90_v6 = vpop.eup %89 }
  0x20   :  { %v92_v7 = vpop.eup %91  ;;  %v49_v8 = vmul.f32 %v90_v6, %v84_v5 }
  0x21   :  { %v50_v9 = vmul.f32 %v92_v7, %v84_v5 }
  0x22   :  { %v52_v10 = vsel %vm51_vm0, %v49_v8, -inf }
  0x23   :  { %53 = vmax.xlane.f32.xlu0 %v52_v10  ;;  %v55_v11 = vsel %vm51_vm0, %v50_v9, -inf }
  0x27   :  { %56 = vmax.xlane.f32.xlu0 %v55_v11 }
  0xac   :  { %v54_v12 = vpop.xlane.xlu0 %53 }
  0xad   :  { %v58_v13 = vadd.f32 0.0001, %v54_v12 }
  0xaf   :  { %93 = vrcp.f32 %v58_v13 }
  0xb0   :  { %v57_v14 = vpop.xlane.xlu0 %56 }
  0xb1   :  { %v59_v15 = vadd.f32 0.0001, %v57_v14 }
  0xb3   :  { %95 = vrcp.f32 %v59_v15 }
  0xbc   :  { %v94_v16 = vpop.eup %93 }
  0xbd   :  { %v62_v17 = vmul.f32 %v94_v16, %v49_v8 }
  0xbf   :  { %64 = vst.msk [vmem:[#allocation5] sm:$0xff] %vm51_vm0, %v62_v17 }
  0xc0   :  { %v96_v18 = vpop.eup %95 }
  0xc1   :  { %v63_v19 = vmul.f32 %v96_v18, %v50_v9 }
  0xc3   :  { %65 = vst.msk [vmem:[#allocation5 + $0x8] sm:$0xff] %vm51_vm0, %v63_v19 }
  0xc4   :  { %128 = shalt.err (!%p125_p9)
}
  0xc5   :  { %77 = dma.vmem_to_hbm [thread:$0]  %s72_s1, 256, %s190_s3, [#allocation4], %s142_s15, %s142_s15, %s143_s16  }
  0xc6   :  { %139 = dma.done.wait [#allocation4], 256  }
  0xc7   :  { %140 = vsyncadd [#allocation4], 4294967040 }
  0xc8   :  { %81 = vsyncpa [#allocation3], 1 }
  0xc9   :  { %82 = vsyncpa [#allocation4], 1 }

</bundles_post_ra>
